<compile_context>
chip_gen: v7x
topology: tpu7x:2x2x1
jax: 0.10.0
libtpu: 0.0.40
codegen_flags: <defaults>
</compile_context>

<pallas_src>
import functools

import numpy as np
import jax
import jax.numpy as jnp
from jax.experimental import pallas as pl
from jax.experimental.pallas import tpu as pltpu


def _default_block_rows() -> int:
    """Chip-aware default tile height (rows of the F-wide block)."""
    try:
        kind = jax.devices()[0].device_kind.lower()
    except Exception:  # pragma: no cover - defensive
        kind = ""
    if "v7" in kind:
        # 3.2 TB/s HBM, 64 MiB VMEM (32 MiB default scoped): 4 MiB tiles keep
        # the ~0.35us per-step overhead under ~10% while double-buffered
        # in+out stays at 16 MiB.
        return 1024
    # v5e / v6e: 2 MiB tiles are ~85% of HBM roofline; bigger buys ~1%.
    return 512


def _identity_kernel(x_ref, o_ref):
    # generator.forward == identity, critic.forward == identity.
    # Stream one lane-dense [rows, F] tile through VMEM.
    o_ref[...] = x_ref[...]


@functools.lru_cache(maxsize=None)
def _get_identity_call(B: int, F: int, dtype_name: str, block_rows: int,
                       donate: bool):
    """Build (once) the pallas_call for a [B, F] identity copy."""
    dtype = jnp.dtype(dtype_name)

    if B <= block_rows:
        if B >= 16:
            # Split into >= 2 blocks so both TensorCores get work on v7x
            # megacore parts (harmless on single-TC v5e/v6e). Block rows are
            # rounded up to a multiple of 8 to satisfy the (8,128) constraint;
            # Pallas masks the partial last tile.
            half = pl.cdiv(B, 2)
            block_rows = ((half + 7) // 8) * 8
            grid = (pl.cdiv(B, block_rows),)
        else:
            # Tiny batch: single full-extent block (exempt from (8,128) rule).
            block_rows = B
            grid = (1,)
    else:
        # block_rows is a multiple of 8 and F (1024) a multiple of 128; a
        # non-divisible B just means a masked partial last tile.
        grid = (pl.cdiv(B, block_rows),)

    itemsize = dtype.itemsize
    cost = pl.CostEstimate(
        flops=0,
        transcendentals=0,
        bytes_accessed=2 * B * F * itemsize,  # pure HBM traffic: read + write
    )

    call = pl.pallas_call(
        _identity_kernel,
        out_shape=jax.ShapeDtypeStruct((B, F), dtype),
        grid=grid,
        in_specs=[pl.BlockSpec((block_rows, F), lambda i: (i, 0))],
        out_specs=pl.BlockSpec((block_rows, F), lambda i: (i, 0)),
        compiler_params=pltpu.CompilerParams(
            dimension_semantics=("parallel",),
        ),
        cost_estimate=cost,
        input_output_aliases={0: 0} if donate else {},
    )

    if donate:
        # Jit wrapper is built exactly once per cache key; donation lets the
        # output alias the input's HBM buffer (input invalid afterwards).
        return jax.jit(call, donate_argnums=(0,))
    return call


def identity_copy(x: jax.Array, *, block_rows: int | None = None,
                  donate: bool = False) -> jax.Array:
    """Pallas kernel for a single identity stage (generator OR critic).

    x: [B, F] array (F = 32*32 = 1024 in the reference module).
    donate=True aliases the output onto the (donated) input buffer; the
    caller's x is INVALID after this call.
    """
    B, F = x.shape
    if block_rows is None:
        block_rows = _default_block_rows()
    call = _get_identity_call(B, F, jnp.dtype(x.dtype).name, int(block_rows),
                              bool(donate))
    return call(x)


class GANPallas:
    """Mirror of the PyTorch GAN module (no parameters, identity stages).

    - generator(x):             identity (one Pallas copy kernel)
    - critic(x):                identity (one Pallas copy kernel)
    - generator_then_critic(x): identity∘identity — short-circuited, returns x
                                with ZERO HBM traffic / kernel launches.
    - __call__(x):              returns None, exactly like GAN.forward.
    """

    def __init__(self, input_size: int = 32 ** 2, latent_dimensions: int = 100):
        # The reference module declares no parameters; nothing to initialize.
        self.input_size = input_size
        self.latent_dimensions = latent_dimensions

    def generator(self, z: jax.Array, **kw) -> jax.Array:
        return identity_copy(z, **kw)

    def critic(self, x: jax.Array, **kw) -> jax.Array:
        return identity_copy(x, **kw)

    def generator_then_critic(self, x: jax.Array) -> jax.Array:
        # Perf feedback: no tile tuning beats zero bytes moved. The fused
        # identity pass is a pure no-op, so skip the kernel entirely.
        return x

    def __call__(self, x):
        # GAN.forward(x) in the reference returns None.
        # TODO(synk): GAN.forward produces no tensor output; nothing to kernelize.
        return None


if __name__ == "__main__":
    key = jax.random.PRNGKey(0)
    batch = 2
    input_size = 32 ** 2          # 1024, as in the module default
    latent_dimensions = 100

    x = jax.random.normal(key, (batch, input_size), dtype=jnp.float32)
    x_np = np.asarray(x)

    model = GANPallas(input_size=input_size, latent_dimensions=latent_dimensions)

    # GAN.forward itself returns None (matching the reference semantics).
    assert model(x) is None

    # Fused generator -> critic path: short-circuited, zero kernel launches.
    fused = model.generator_then_critic(x)
    assert fused is x

    # Individual stages still go through the Pallas copy kernel.
    g = jax.block_until_ready(model.generator(x))
    assert g.shape == x_np.shape and g.dtype == jnp.float32
    assert bool(jnp.allclose(g, x_np))

    # Exercise the megacore split path (16 <= B <= block_rows -> grid of 2,
    # masked partial last tile): B = 20.
    key2 = jax.random.PRNGKey(1)
    y = jax.random.normal(key2, (20, input_size), dtype=jnp.float32)
    y_out = jax.block_until_ready(model.critic(y))
    assert y_out.shape == y.shape and bool(jnp.allclose(y_out, y))

    # Exercise the B > block_rows remainder path: grid = cdiv(20, 8) = 3.
    y_out2 = jax.block_until_ready(model.generator(y, block_rows=8))
    assert bool(jnp.allclose(y_out2, y))

    # Exercise the donated / aliased path (input invalid afterwards).
    z = jax.random.normal(jax.random.PRNGKey(2), (batch, input_size),
                          dtype=jnp.float32)
    z_np = np.asarray(z)
    z_out = jax.block_until_ready(model.critic(z, donate=True))
    assert bool(jnp.allclose(z_out, z_np))

    # Repeat a call to confirm the cached (non-re-jitted) path also works.
    g2 = jax.block_until_ready(model.generator(x))
    assert bool(jnp.allclose(g2, x_np))

    print("KERNEL_OK")
</pallas_src>

<mosaic_0001>
module attributes {stable_mosaic.version = 11 : i64} {
  func.func @_identity_kernel(%arg0: i32, %arg1: memref<2x1024xf32, #tpu.memory_space<vmem>>, %arg2: memref<2x1024xf32, #tpu.memory_space<vmem>>) attributes {dimension_semantics = [#tpu.dimension_semantics<parallel>], iteration_bounds = array<i64: 1>, scalar_prefetch = 0 : i64, scratch_operands = 0 : i64, tpu.core_type = #tpu.core_type<tc>, window_params = [{transform_indices = @transform_0, window_bounds = array<i64: 2, 1024>}, {transform_indices = @transform_1, window_bounds = array<i64: 2, 1024>}]} {
    %c0 = arith.constant 0 : index
    %c0_0 = arith.constant 0 : index
    %0 = vector.load %arg1[%c0, %c0_0] : memref<2x1024xf32, #tpu.memory_space<vmem>>, vector<2x1024xf32>
    %c0_1 = arith.constant 0 : index
    %c0_2 = arith.constant 0 : index
    %1 = vector.load %arg2[%c0_1, %c0_2] : memref<2x1024xf32, #tpu.memory_space<vmem>>, vector<2x1024xf32>
    tpu.vector_store %arg2[%c0_1, %c0_2], %0 {strides = array<i32>} : memref<2x1024xf32, #tpu.memory_space<vmem>>, vector<2x1024xf32>,
    return
  }
  func.func @transform_0(%arg0: i32) -> (i32, i32) {
    %c0_i32 = arith.constant 0 : i32
    %c0_i32_0 = arith.constant 0 : i32
    return %arg0, %c0_i32 : i32, i32
  }
  func.func @transform_1(%arg0: i32) -> (i32, i32) {
    %c0_i32 = arith.constant 0 : i32
    %c0_i32_0 = arith.constant 0 : i32
    return %arg0, %c0_i32 : i32, i32
  }
}

</mosaic_0001>

<bundles_post_ra>
// kernel: tpu_custom_call.1
= control target key start
LH: loop header
LB: loop body
LE: loop exit
PB: predicated region body
PF: predicated region fallthrough
CT: control target
= control target key end

     0   :  { %6 = vsyncpa [#allocation3], 0  ;;  %s126_s0 = inlined_call_operand.hbm [shape: f32[2,1024], index: 0, kind: input, shape index: {}]   ;;  %s127_s1 = inlined_call_operand.hbm [shape: f32[2,1024], index: 1, kind: output, shape index: {}]  }
   0x1   :  { %7 = vsyncpa [#allocation4], 0  ;;  %s90_s6 = smov [#allocation2]   ;;  %s42_s10 = scalar_lea.hbm %s126_s0, 256 }
   0x2   :  { %s14_s7 = sshll.u32 %s90_s6, 4  ;;  %p43_p0 = scmp.ne.s32.totalorder %s126_s0, %s42_s10  ;;  %s15_s7 = int_to_ptr.vmem [resolvable:$true] %s14_s7 }
   0x3   :  { %p46_p1 = scmp.lt.u32.totalorder %s42_s10, %s126_s0 }
   0x5   :  { %p48_p2 = pnand %p46_p1, %p43_p0 }
   0x7   :  { %51 = shalt.err (!%p48_p2)
}
   0x8   :  { %s52_s15 = scalar_lea.vmem %s15_s7, 256  ;;  %p57_p4 = scmp.lt.s32.totalorder %s15_s7, %s15_s7 }
   0x9   :  { %p53_p3 = scmp.ne.s32.totalorder %s15_s7, %s52_s15  ;;  %p58_p5 = scmp.lt.s32.totalorder %s52_s15, %s52_s15 }
   0xb   :  { %p59_p6 = por %p58_p5, %p57_p4 }
   0xd   :  { %p60_p7 = pnand %p59_p6, %p53_p3 }
   0xf   :  { %63 = shalt.err (!%p60_p7)
}
  0x10   :  { %17 = dma.hbm_to_vmem [thread:$0]  %s126_s0, 256, %s15_s7, [#allocation3]  }
  0x11   :  { %86 = dma.done.wait [#allocation3], 256  }
  0x12   :  { %87 = vsyncadd [#allocation3], 4294967040  ;;  %s91_s18 = smov [#allocation5]   ;;  %v21_v0 = vld [vmem:[#allocation2] sm:$0xff]  ;;  %v22_v1 = vld [vmem:[#allocation2 + $0x8] sm:$0xff] }
  0x13   :  { %s31_s19 = sshll.u32 %s91_s18, 4  ;;  %23 = vst [vmem:[#allocation5] sm:$0xff] %v21_v0  ;;  %24 = vst [vmem:[#allocation5 + $0x8] sm:$0xff] %v22_v1  ;;  %s32_s19 = int_to_ptr.vmem [resolvable:$true] %s31_s19 }
  0x14   :  { %s64_s20 = scalar_lea.vmem %s32_s19, 256  ;;  %p69_p9 = scmp.lt.s32.totalorder %s32_s19, %s32_s19 }
  0x15   :  { %p65_p8 = scmp.ne.s32.totalorder %s32_s19, %s64_s20  ;;  %p70_p10 = scmp.lt.s32.totalorder %s64_s20, %s64_s20 }
  0x17   :  { %p71_p11 = por %p70_p10, %p69_p9 }
  0x19   :  { %p72_p12 = pnand %p71_p11, %p65_p8 }
  0x1b   :  { %75 = shalt.err (!%p72_p12)
}
  0x1c   :  { %s76_s0 = scalar_lea.hbm %s127_s1, 256 }
  0x1d   :  { %p77_p13 = scmp.ne.s32.totalorder %s127_s1, %s76_s0  ;;  %p80_p0 = scmp.lt.u32.totalorder %s76_s0, %s127_s1 }
  0x1f   :  { %p82_p1 = pnand %p80_p0, %p77_p13 }
  0x21   :  { %85 = shalt.err (!%p82_p1)
}
  0x22   :  { %34 = dma.vmem_to_hbm [thread:$0]  %s32_s19, 256, %s127_s1, [#allocation4]  }
  0x23   :  { %88 = dma.done.wait [#allocation4], 256  }
  0x24   :  { %89 = vsyncadd [#allocation4], 4294967040 }
  0x25   :  { %38 = vsyncpa [#allocation3], 1 }
  0x26   :  { %39 = vsyncpa [#allocation4], 1 }

</bundles_post_ra>
